<compile_context>
chip_gen: v5e
topology: v5e:2x2
jax: 0.10.0
libtpu: 0.0.40
codegen_flags: <defaults>
</compile_context>

<pallas_src>
import functools

import jax
import jax.numpy as jnp
from jax.experimental import pallas as pl
from jax.experimental.pallas import tpu as pltpu


def attention_kernel(feat_ref, wah_ref, uw_ref, aw_ref, alpha_ref, ctx_ref,
                     *, L_true):
    bB, Lp, E = feat_ref.shape
    A = uw_ref.shape[1]

    feat = feat_ref[...]                                        # (bB, Lp, E) bf16

    # U projection: one (bB*Lp, E) @ (E, A) bf16 MXU matmul, f32 accumulation.
    u_hs = jnp.dot(feat.reshape(bB * Lp, E), uw_ref[...],
                   preferred_element_type=jnp.float32)          # (bB*Lp, A) f32

    # combined = tanh(U(features) + (W(hidden) + U_b)); W(hidden)+U_b is
    # precomputed in the wrapper.  Elementwise math in f32 (no bf16 VPU/EUP
    # on v5e).
    comb = jnp.tanh(u_hs.reshape(bB, Lp, A)
                    + wah_ref[...][:, None, :])                 # (bB, Lp, A)

    # Scores: contract the attention dim (lanes) against the A weight ->
    # lane-dense (bB, Lp).  A bias dropped: softmax is shift-invariant and raw
    # scores are not a module output.
    scores = jnp.sum(comb * aw_ref[...][None, :, :], axis=-1)   # (bB, Lp)

    # Mask padded L lanes so no softmax mass leaks onto padding.
    if Lp != L_true:
        lane = jax.lax.broadcasted_iota(jnp.int32, (bB, Lp), 1)
        scores = jnp.where(lane < L_true, scores, -1e30)

    # Softmax over L along the lane axis (bB independent rows per XLU reduce).
    m = jnp.max(scores, axis=-1, keepdims=True)                 # (bB, 1)
    e = jnp.exp(scores - m)                                     # (bB, Lp)
    denom = jnp.sum(e, axis=-1, keepdims=True)                  # (bB, 1)
    alpha = e * pl.reciprocal(denom, approx=True)               # (bB, Lp)

    # context = sum_L(features * alpha): VPU multiply + sublane (axis=1)
    # reduce -- avoids bB separate M=1 MXU pushes and matches the reference
    # computation exactly.
    ctx = jnp.sum(feat.astype(jnp.float32) * alpha[:, :, None], axis=1)  # (bB, E)

    alpha_ref[...] = alpha                                      # lane-dense (bB, Lp)
    ctx_ref[...] = ctx                                          # lane-dense (bB, E)


def _pick_block_b(B, Lp, E, A, vmem_budget_bytes=32 << 20):
    """Largest sublane-aligned batch block whose full pipelined working set
    fits the budget.  32 MiB is conservative for v7x (64 MiB/TC VMEM); it can
    be raised towards 48-64 MiB on v5e/v6e (128 MiB VMEM)."""
    per_row = (2 * Lp * E * 2        # features block (bf16), double-buffered
               + 2 * A * 4           # w_ah block (f32), double-buffered
               + 2 * Lp * A * 4      # u_hs + tanh f32 intermediates
               + Lp * E * 4          # f32 view of features for the context sum
               + 2 * (Lp + E) * 4)   # alpha + ctx out blocks, double-buffered
    fixed = 2 * (E * A * 2 + A * 4)  # resident U weight (bf16) + A weight (f32)
    cap = max(1, max(0, vmem_budget_bytes - fixed) // per_row)
    bB = int(min(B, 256, cap))
    bB = max(8, (bB // 8) * 8)       # out-block sublane alignment
    # Keep >=2 grid steps when the batch allows it (v7x: 2 TensorCores/chip).
    B8 = ((B + 7) // 8) * 8
    if B8 >= 16:
        bB = min(bB, max(8, (B8 // 2 // 8) * 8))
    return bB


def attention_forward(features, hidden, params, block_b=None):
    """features: (B, L, E), hidden: (B, D) -> (alpha (B, L), context (B, E))."""
    B, L, E = features.shape
    A = params["U_w"].shape[0]
    f32, bf16 = jnp.float32, jnp.bfloat16

    # Hidden projection hoisted out of the kernel (one small XLA matmul); U_b
    # folded in so the kernel adds a single per-batch vector (exact rewrite).
    w_ah = (hidden.astype(f32) @ params["W_w"].T.astype(f32)
            + params["W_b"].astype(f32) + params["U_b"].astype(f32))     # (B, A)

    uw_t = params["U_w"].T.astype(bf16)                                  # (E, A)
    aw = params["A_w"].reshape(1, A).astype(f32)                         # (1, A)
    # params["A_b"] intentionally unused: constant shift, softmax-invariant.

    # Pad L to a multiple of 16 so the bf16 (bB, Lp, E) -> (bB*Lp, E) collapse
    # is layout-free; padded lanes are masked inside the kernel.
    Lp = ((L + 15) // 16) * 16
    feat = features.astype(bf16)
    if Lp != L:
        feat = jnp.pad(feat, ((0, 0), (0, Lp - L), (0, 0)))

    if block_b is None:
        bB = _pick_block_b(B, Lp, E, A)
    else:
        bB = max(8, ((int(block_b) + 7) // 8) * 8)
    Bp = ((B + bB - 1) // bB) * bB
    if Bp != B:
        feat = jnp.pad(feat, ((0, Bp - B), (0, 0), (0, 0)))
        w_ah = jnp.pad(w_ah, ((0, Bp - B), (0, 0)))

    kernel = functools.partial(attention_kernel, L_true=L)

    alpha, ctx = pl.pallas_call(
        kernel,
        out_shape=(jax.ShapeDtypeStruct((Bp, Lp), f32),
                   jax.ShapeDtypeStruct((Bp, E), f32)),
        grid=(Bp // bB,),
        in_specs=[
            pl.BlockSpec((bB, Lp, E), lambda b: (b, 0, 0)),   # features (bf16)
            pl.BlockSpec((bB, A), lambda b: (b, 0)),          # W(hidden)+U_b
            pl.BlockSpec((E, A), lambda b: (0, 0)),           # U weight (bf16)
            pl.BlockSpec((1, A), lambda b: (0, 0)),           # A weight
        ],
        out_specs=(pl.BlockSpec((bB, Lp), lambda b: (b, 0)),  # alpha
                   pl.BlockSpec((bB, E), lambda b: (b, 0))),  # context
        compiler_params=pltpu.CompilerParams(
            dimension_semantics=("parallel",),                # megacore-shardable
            vmem_limit_bytes=48 << 20),
    )(feat, w_ah, uw_t, aw)

    return alpha[:B, :L], ctx[:B]


def init_params(key, encoder_dim, decoder_dim, attention_dim):
    """Deterministic init mimicking nn.Linear default U(-1/sqrt(fan_in), ...)."""
    ks = jax.random.split(key, 6)

    def lin(kw, kb, fan_in, fan_out):
        bound = 1.0 / float(fan_in) ** 0.5
        w = jax.random.uniform(kw, (fan_out, fan_in), jnp.float32, -bound, bound)
        b = jax.random.uniform(kb, (fan_out,), jnp.float32, -bound, bound)
        return w, b

    W_w, W_b = lin(ks[0], ks[1], decoder_dim, attention_dim)
    U_w, U_b = lin(ks[2], ks[3], encoder_dim, attention_dim)
    A_w, A_b = lin(ks[4], ks[5], attention_dim, 1)
    return dict(W_w=W_w, W_b=W_b, U_w=U_w, U_b=U_b, A_w=A_w, A_b=A_b)


def attention_ref(features, hidden, p):
    """Pure-JAX reference mirroring the PyTorch forward."""
    u_hs = features @ p["U_w"].T + p["U_b"]                    # (B, L, A)
    w_ah = hidden @ p["W_w"].T + p["W_b"]                      # (B, A)
    comb = jnp.tanh(u_hs + w_ah[:, None, :])                   # (B, L, A)
    scores = (comb @ p["A_w"].T)[..., 0] + p["A_b"][0]         # (B, L)
    alpha = jax.nn.softmax(scores, axis=1)                     # (B, L)
    ctx = jnp.sum(features * alpha[:, :, None], axis=1)        # (B, E)
    return alpha, ctx


if __name__ == "__main__":
    B, L = 2, 8                 # batch, number of encoder regions (seq)
    encoder_dim = 32
    decoder_dim = 24
    attention_dim = 16

    key = jax.random.PRNGKey(0)
    k_feat, k_hid, k_par = jax.random.split(key, 3)

    features = jax.random.normal(k_feat, (B, L, encoder_dim), jnp.float32)
    hidden = jax.random.normal(k_hid, (B, decoder_dim), jnp.float32)
    params = init_params(k_par, encoder_dim, decoder_dim, attention_dim)

    alpha, ctx = attention_forward(features, hidden, params)
    jax.block_until_ready((alpha, ctx))
    assert alpha.shape == (B, L) and ctx.shape == (B, encoder_dim)

    # Tight check against a reference fed the same bf16-quantized features /
    # U weight that the kernel streams from HBM (isolates kernel bugs from the
    # deliberate bf16-streaming precision policy).
    params_q = dict(params,
                    U_w=params["U_w"].astype(jnp.bfloat16).astype(jnp.float32))
    feat_q = features.astype(jnp.bfloat16).astype(jnp.float32)
    alpha_q, ctx_q = attention_ref(feat_q, hidden, params_q)
    assert jnp.allclose(alpha, alpha_q, rtol=2e-3, atol=2e-3), "alpha mismatch"
    assert jnp.allclose(ctx, ctx_q, rtol=2e-3, atol=2e-3), "context mismatch"

    # Loose sanity check against the full-f32 reference: the gap is the bf16
    # feature/U-weight stream (the perf-review-requested optimization) plus the
    # approx softmax reciprocal.
    alpha_f, ctx_f = attention_ref(features, hidden, params)
    assert jnp.allclose(alpha, alpha_f, rtol=5e-2, atol=5e-2), "alpha drift too large"
    assert jnp.allclose(ctx, ctx_f, rtol=5e-2, atol=5e-2), "context drift too large"

    print("KERNEL_OK")
</pallas_src>

<mosaic_0001>
module attributes {stable_mosaic.version = 11 : i64} {
  func.func @attention_kernel(%arg0: i32, %arg1: memref<8x16x32xbf16, #tpu.memory_space<vmem>>, %arg2: memref<8x16xf32, #tpu.memory_space<vmem>>, %arg3: memref<32x16xbf16, #tpu.memory_space<vmem>>, %arg4: memref<1x16xf32, #tpu.memory_space<vmem>>, %arg5: memref<8x16xf32, #tpu.memory_space<vmem>>, %arg6: memref<8x32xf32, #tpu.memory_space<vmem>>) attributes {dimension_semantics = [#tpu.dimension_semantics<parallel>], iteration_bounds = array<i64: 1>, scalar_prefetch = 0 : i64, scratch_operands = 0 : i64, tpu.core_type = #tpu.core_type<tc>, window_params = [{transform_indices = @transform_0, window_bounds = array<i64: 8, 16, 32>}, {transform_indices = @transform_1, window_bounds = array<i64: 8, 16>}, {pipeline_mode = #tpu.pipeline_mode<synchronous>, transform_indices = @transform_2, window_bounds = array<i64: 32, 16>}, {pipeline_mode = #tpu.pipeline_mode<synchronous>, transform_indices = @transform_3, window_bounds = array<i64: 1, 16>}, {transform_indices = @transform_4, window_bounds = array<i64: 8, 16>}, {transform_indices = @transform_5, window_bounds = array<i64: 8, 32>}]} {
    %c0 = arith.constant 0 : index
    %c0_0 = arith.constant 0 : index
    %c0_1 = arith.constant 0 : index
    %0 = vector.load %arg1[%c0, %c0_0, %c0_1] : memref<8x16x32xbf16, #tpu.memory_space<vmem>>, vector<8x16x32xbf16>
    %1 = vector.shape_cast %0 : vector<8x16x32xbf16> to vector<128x32xbf16>
    %c0_2 = arith.constant 0 : index
    %c0_3 = arith.constant 0 : index
    %2 = vector.load %arg3[%c0_2, %c0_3] : memref<32x16xbf16, #tpu.memory_space<vmem>>, vector<32x16xbf16>
    %cst = arith.constant dense<0.000000e+00> : vector<128x16xf32>
    %3 = tpu.matmul %1, %2, %cst {dimension_numbers = #tpu.dot_dimension_numbers<[1], [0], [0], [1], [0, 0, 1, 1], [], []>} : vector<128x32xbf16>, vector<32x16xbf16>, vector<128x16xf32> -> vector<128x16xf32>
    %4 = vector.shape_cast %3 : vector<128x16xf32> to vector<8x16x16xf32>
    %c0_4 = arith.constant 0 : index
    %c0_5 = arith.constant 0 : index
    %5 = vector.load %arg2[%c0_4, %c0_5] : memref<8x16xf32, #tpu.memory_space<vmem>>, vector<8x16xf32>
    %6 = vector.shape_cast %5 : vector<8x16xf32> to vector<8x1x16xf32>
    %7 = vector.broadcast %6 : vector<8x1x16xf32> to vector<8x16x16xf32>
    %8 = arith.addf %4, %7 : vector<8x16x16xf32>
    %9 = math.tanh %8 : vector<8x16x16xf32>
    %c0_6 = arith.constant 0 : index
    %c0_7 = arith.constant 0 : index
    %10 = vector.load %arg4[%c0_6, %c0_7] : memref<1x16xf32, #tpu.memory_space<vmem>>, vector<1x16xf32>
    %11 = vector.shape_cast %10 : vector<1x16xf32> to vector<1x1x16xf32>
    %12 = vector.broadcast %11 : vector<1x1x16xf32> to vector<8x16x16xf32>
    %13 = arith.mulf %9, %12 : vector<8x16x16xf32>
    %cst_8 = arith.constant dense<0.000000e+00> : vector<8x16xf32>
    %14 = vector.multi_reduction <add>, %13, %cst_8 [2] : vector<8x16x16xf32> to vector<8x16xf32>
    %15 = tpu.iota {dimensions = array<i32: 1>} : vector<8x16xi32>
    %c8_i32 = arith.constant 8 : i32
    %16 = vector.broadcast %c8_i32 : i32 to vector<8x16xi32>
    %17 = arith.cmpi slt, %15, %16 : vector<8x16xi32>
    %cst_9 = arith.constant -1.000000e+30 : f32
    %18 = vector.broadcast %cst_9 : f32 to vector<8x16xf32>
    %19 = arith.select %17, %14, %18 : vector<8x16xi1>, vector<8x16xf32>
    %cst_10 = arith.constant dense<0xFF800000> : vector<8xf32>
    %20 = vector.multi_reduction <maximumf>, %19, %cst_10 [1] : vector<8x16xf32> to vector<8xf32>
    %21 = vector.shape_cast %20 : vector<8xf32> to vector<8x1xf32>
    %22 = vector.broadcast %21 : vector<8x1xf32> to vector<8x16xf32>
    %23 = arith.subf %19, %22 : vector<8x16xf32>
    %24 = math.exp %23 : vector<8x16xf32>
    %cst_11 = arith.constant dense<0.000000e+00> : vector<8xf32>
    %25 = vector.multi_reduction <add>, %24, %cst_11 [1] : vector<8x16xf32> to vector<8xf32>
    %26 = vector.shape_cast %25 : vector<8xf32> to vector<8x1xf32>
    %27 = tpu.reciprocal %26 {approx = true} : vector<8x1xf32> -> vector<8x1xf32>
    %28 = vector.broadcast %27 : vector<8x1xf32> to vector<8x16xf32>
    %29 = arith.mulf %24, %28 : vector<8x16xf32>
    %30 = arith.extf %0 : vector<8x16x32xbf16> to vector<8x16x32xf32>
    %31 = vector.shape_cast %29 : vector<8x16xf32> to vector<8x16x1xf32>
    %32 = vector.broadcast %31 : vector<8x16x1xf32> to vector<8x16x32xf32>
    %33 = arith.mulf %30, %32 : vector<8x16x32xf32>
    %cst_12 = arith.constant dense<0.000000e+00> : vector<8x32xf32>
    %34 = vector.multi_reduction <add>, %33, %cst_12 [1] : vector<8x16x32xf32> to vector<8x32xf32>
    %c0_13 = arith.constant 0 : index
    %c0_14 = arith.constant 0 : index
    %35 = vector.load %arg5[%c0_13, %c0_14] : memref<8x16xf32, #tpu.memory_space<vmem>>, vector<8x16xf32>
    tpu.vector_store %arg5[%c0_13, %c0_14], %29 {strides = array<i32>} : memref<8x16xf32, #tpu.memory_space<vmem>>, vector<8x16xf32>,
    %c0_15 = arith.constant 0 : index
    %c0_16 = arith.constant 0 : index
    %36 = vector.load %arg6[%c0_15, %c0_16] : memref<8x32xf32, #tpu.memory_space<vmem>>, vector<8x32xf32>
    tpu.vector_store %arg6[%c0_15, %c0_16], %34 {strides = array<i32>} : memref<8x32xf32, #tpu.memory_space<vmem>>, vector<8x32xf32>,
    return
  }
  func.func @transform_0(%arg0: i32) -> (i32, i32, i32) {
    %c0_i32 = arith.constant 0 : i32
    %c0_i32_0 = arith.constant 0 : i32
    %c0_i32_1 = arith.constant 0 : i32
    return %arg0, %c0_i32, %c0_i32_0 : i32, i32, i32
  }
  func.func @transform_1(%arg0: i32) -> (i32, i32) {
    %c0_i32 = arith.constant 0 : i32
    %c0_i32_0 = arith.constant 0 : i32
    return %arg0, %c0_i32 : i32, i32
  }
  func.func @transform_2(%arg0: i32) -> (i32, i32) {
    %c0_i32 = arith.constant 0 : i32
    %c0_i32_0 = arith.constant 0 : i32
    %c0_i32_1 = arith.constant 0 : i32
    return %c0_i32, %c0_i32_0 : i32, i32
  }
  func.func @transform_3(%arg0: i32) -> (i32, i32) {
    %c0_i32 = arith.constant 0 : i32
    %c0_i32_0 = arith.constant 0 : i32
    %c0_i32_1 = arith.constant 0 : i32
    return %c0_i32, %c0_i32_0 : i32, i32
  }
  func.func @transform_4(%arg0: i32) -> (i32, i32) {
    %c0_i32 = arith.constant 0 : i32
    %c0_i32_0 = arith.constant 0 : i32
    return %arg0, %c0_i32 : i32, i32
  }
  func.func @transform_5(%arg0: i32) -> (i32, i32) {
    %c0_i32 = arith.constant 0 : i32
    %c0_i32_0 = arith.constant 0 : i32
    return %arg0, %c0_i32 : i32, i32
  }
}

</mosaic_0001>

<bundles_post_ra>
// kernel: tpu_custom_call.1
= control target key start
LH: loop header
LB: loop body
LE: loop exit
PB: predicated region body
PF: predicated region fallthrough
CT: control target
= control target key end

     0   :  { %11 = vsyncpa [#allocation3], 0  ;;  %s994_s0 = inlined_call_operand.hbm [shape: bf16[8,16,32], index: 0, kind: input, shape index: {}]   ;;  %s995_s1 = inlined_call_operand.vmem [shape: f32[8,16], index: 1, kind: input, shape index: {}]   ;;  %s996_s2 = inlined_call_operand.vmem [shape: bf16[32,16], index: 2, kind: input, shape index: {}]   ;;  %s997_s3 = inlined_call_operand.vmem [shape: f32[1,16], index: 3, kind: input, shape index: {}]   ;;  %s998_s4 = inlined_call_operand.hbm [shape: f32[8,16], index: 4, kind: output, shape index: {0}]   ;;  %s999_s5 = inlined_call_operand.hbm [shape: f32[8,32], index: 5, kind: output, shape index: {1}]  }
   0x1   :  { %12 = vsyncpa [#allocation4], 0 }
   0x2   :  { %13 = vsyncpa [#allocation7], 0  ;;  %s18_s20 = sshll.u32 %s994_s0, 4  ;;  %s837_s21 = smov [#allocation2]   ;;  %s19_s20 = int_to_ptr.hbm [resolvable:$true] %s18_s20 }
   0x3   :  { %s20_s22 = sshll.u32 %s837_s21, 4  ;;  %s838_s23 = smov 64   ;;  %s21_s22 = int_to_ptr.vmem [resolvable:$true] %s20_s22 }
   0x4   :  { %s839_s24 = smov 4  }
   0x5   :  { %26 = dma.hbm_to_vmem [thread:$0]  %s19_s20, 1024, %s21_s22, [#allocation3], %s838_s23, %s838_s23, %s839_s24  }
   0x6   :  { %831 = dma.done.wait [#allocation3], 1024  }
   0x7   :  { %832 = vsyncadd [#allocation3], 4294966272  ;;  %v698_v0 = vld [vmem:[%s996_s2 + $0x8] sm:$0xff]  ;;  %v697_v1 = vld [vmem:[%s996_s2] sm:$0xff]  ;;  %vm110_vm0 = vcmask 261120   ;;  %vm261_vm1 = vcmask 130048  }
   0x8   :  { %141 = vmatpush.bf16.msra.mxu0 %v698_v0  ;;  %699 = vmatpush.bf16.msra.mxu1 %v698_v0  ;;  %v689_v2 = vld [vmem:[#allocation2] sm:$0xff]  ;;  %v691_v3 = vld [vmem:[#allocation2 + $0x10] sm:$0xff]  ;;  %v690_v6 = vld [vmem:[#allocation2 + $0x8] sm:$0xff]  ;;  %vm332_vm2 = vcmask 130112   ;;  %vm355_vm3 = vcmask 1041409   ;;  %vm357_vm4 = vcmask 1042434  }
   0x9   :  { %700 = vmatpush.bf16.msra.mxu2 %v698_v0  ;;  %701 = vmatpush.bf16.msra.mxu3 %v698_v0  ;;  %v693_v4 = vld [vmem:[#allocation2 + $0x20] sm:$0xff]  ;;  %v695_v5 = vld [vmem:[#allocation2 + $0x30] sm:$0xff]  ;;  %v692_v7 = vld [vmem:[#allocation2 + $0x18] sm:$0xff]  ;;  %vm359_vm5 = vcmask 1043459   ;;  %vm361_vm6 = vcmask 1044484   ;;  %vm363_vm7 = vcmask 1045509  }
   0xa   :  { %v694_v8 = vld [vmem:[#allocation2 + $0x28] sm:$0xff]  ;;  %v696_v9 = vld [vmem:[#allocation2 + $0x38] sm:$0xff]  ;;  %v892_v10 = vld [vmem:[%s995_s1] sm:$0xff]  ;;  %vm365_vm8 = vcmask 1046534   ;;  %vm367_vm9 = vcmask 1047559   ;;  %s615_s6 = sshll.u32 %s998_s4, 4  ;;  %s616_s6 = int_to_ptr.hbm [resolvable:$true] %s615_s6 }
   0xb   :  { %v187_v11 = vrot.slane %v892_v10, 2  ;;  %v193_v12 = vperm.slane %v892_v10, 0  ;;  %v189_v16 = vrot.slane %v892_v10, 4  ;;  %v191_v17 = vrot.slane %v892_v10, 6  ;;  %v903_v22 = vld [vmem:[%s997_s3] ss:$0 sm:$0xff] }
   0xc   :  { %142 = vmatpush.bf16.msra.mxu0 %v697_v1  ;;  %702 = vmatpush.bf16.msra.mxu1 %v697_v1  ;;  %v186_v30 = vrot.slane %v892_v10, 1  ;;  %v190_v43 = vrot.slane %v892_v10, 5  ;;  %v188_v47 = vrot.slane %v892_v10, 3  ;;  %v192_v62 = vrot.slane %v892_v10, 7  ;;  %s840_s7 = smov [#allocation5]   ;;  %s841_s4 = smov [#allocation6]  }
   0xd   :  { %703 = vmatpush.bf16.msra.mxu2 %v697_v1  ;;  %704 = vmatpush.bf16.msra.mxu3 %v697_v1  ;;  %v195_v13 = vperm.slane %v187_v11, 0  ;;  %v197_v20 = vperm.slane %v189_v16, 0  ;;  %v898_v21 = vperm.slane %v191_v17, 0  ;;  %s613_s8 = sshll.u32 %s840_s7, 4  ;;  %s624_s9 = sshll.u32 %s841_s4, 4  ;;  %s614_s8 = int_to_ptr.vmem [resolvable:$true] %s613_s8  ;;  %s625_s9 = int_to_ptr.vmem [resolvable:$true] %s624_s9 }
   0xe   :  { %v194_v38 = vperm.slane %v186_v30, 0  ;;  %v198_v52 = vperm.slane %v190_v43, 0  ;;  %v196_v56 = vperm.slane %v188_v47, 0  ;;  %s626_s12 = sshll.u32 %s999_s5, 4  ;;  %s627_s12 = int_to_ptr.hbm [resolvable:$true] %s626_s12 }
   0xf   :  { %681 = vmatmul.msk.bf16.vlgmr.msra.gmra.mxu0 %vm110_vm0, %v689_v2  ;;  %683 = vmatmul.msk.bf16.vlgmr.msra.gmra.mxu1 %vm110_vm0, %v691_v3 }
  0x10   :  { %685 = vmatmul.msk.bf16.vlgmr.msra.gmra.mxu2 %vm110_vm0, %v693_v4  ;;  %687 = vmatmul.msk.bf16.vlgmr.msra.gmra.mxu3 %vm110_vm0, %v695_v5 }
  0x1f   :  { %682 = vmatmul.msk.bf16.gmra.mxu0 %vm110_vm0, %v690_v6  ;;  %684 = vmatmul.msk.bf16.gmra.mxu1 %vm110_vm0, %v692_v7  ;;  %v200_v6 = vperm.slane %v192_v62, 0 }
  0x20   :  { %686 = vmatmul.msk.bf16.gmra.mxu2 %vm110_vm0, %v694_v8  ;;  %688 = vmatmul.msk.bf16.gmra.mxu3 %vm110_vm0, %v696_v9 }
  0x8c   :  { %v144_v14 = vpop.f32.mrf.mxu0  ;;  %v154_v15 = vpop.f32.mrf.mxu1 }
  0x8d   :  { %v209_v18 = vadd.f32 %v193_v12, %v144_v14  ;;  %v213_v19 = vadd.f32 %v195_v13, %v154_v15 }
  0x8f   :  { %723 = vtanh.f32 %v209_v18 }
  0x90   :  { %725 = vtanh.f32 %v213_v19 }
  0x93   :  { %v164_v23 = vpop.f32.mrf.mxu2  ;;  %v174_v24 = vpop.f32.mrf.mxu3 }
  0x94   :  { %v217_v25 = vadd.f32 %v197_v20, %v164_v23  ;;  %v146_v26 = vpop.f32.mrf.mxu0  ;;  %v221_v27 = vadd.f32 %v898_v21, %v174_v24  ;;  %v156_v28 = vpop.f32.mrf.mxu1 }
  0x95   :  { %v724_v29 = vpop.eup %723  ;;  %v214_v33 = vadd.f32 %v195_v13, %v156_v28  ;;  %v210_v35 = vadd.f32 %v193_v12, %v146_v26 }
  0x96   :  { %v726_v31 = vpop.eup %725  ;;  %727 = vtanh.f32 %v217_v25  ;;  %v245_v32 = vmul.f32 %v724_v29, %v903_v22 }
  0x97   :  { %v249_v34 = vmul.f32 %v726_v31, %v903_v22  ;;  %729 = vtanh.f32 %v221_v27 }
  0x98   :  { %v262_v36 = vsel %vm261_vm1, %v245_v32, 0.0  ;;  %731 = vtanh.f32 %v214_v33 }
  0x99   :  { %v274_v37 = vsel %vm261_vm1, %v249_v34, 0.0  ;;  %263 = vadd.xlane.f32.xlu0 %v262_v36  ;;  %733 = vtanh.f32 %v210_v35 }
  0x9a   :  { %275 = vadd.xlane.f32.xlu2 %v274_v37 }
  0x9b   :  { %v166_v39 = vpop.f32.mrf.mxu2  ;;  %v911_v40 = vpop.f32.mrf.mxu3 }
  0x9c   :  { %v728_v41 = vpop.eup %727  ;;  %v149_v42 = vpop.f32.mrf.mxu0  ;;  %v218_v51 = vadd.f32 %v197_v20, %v166_v39  ;;  %v222_v30 = vadd.f32 %v898_v21, %v911_v40 }
  0x9d   :  { %v211_v44 = vadd.f32 %v194_v38, %v149_v42  ;;  %v253_v45 = vmul.f32 %v728_v41, %v903_v22  ;;  %v730_v46 = vpop.eup %729  ;;  %v159_v55 = vpop.f32.mrf.mxu1 }
  0x9e   :  { %v257_v49 = vmul.f32 %v730_v46, %v903_v22  ;;  %v732_v50 = vpop.eup %731  ;;  %v215_v1 = vadd.f32 %v196_v56, %v159_v55 }
  0x9f   :  { %735 = vtanh.f32 %v211_v44  ;;  %v286_v48 = vsel %vm261_vm1, %v253_v45, 0.0  ;;  %v734_v54 = vpop.eup %733  ;;  %v250_v58 = vmul.f32 %v732_v50, %v903_v22 }
  0xa0   :  { %v298_v53 = vsel %vm261_vm1, %v257_v49, 0.0  ;;  %737 = vtanh.f32 %v218_v51  ;;  %v246_v0 = vmul.f32 %v734_v54, %v903_v22 }
  0xa1   :  { %299 = vadd.xlane.f32.xlu0 %v298_v53  ;;  %v277_v4 = vsel %vm261_vm1, %v250_v58, 0.0 }
  0xa2   :  { %287 = vadd.xlane.f32.xlu2 %v286_v48  ;;  %v265_v7 = vsel %vm261_vm1, %v246_v0, 0.0 }
  0xa3   :  { %v169_v57 = vpop.f32.mrf.mxu2  ;;  %v179_v59 = vpop.f32.mrf.mxu3 }
  0xa4   :  { %v219_v60 = vadd.f32 %v198_v52, %v169_v57  ;;  %v151_v61 = vpop.f32.mrf.mxu0  ;;  %v223_v14 = vadd.f32 %v200_v6, %v179_v59 }
  0xa5   :  { %v736_v63 = vpop.eup %735  ;;  %v212_v3 = vadd.f32 %v194_v38, %v151_v61  ;;  %v161_v13 = vpop.f32.mrf.mxu1 }
  0xa6   :  { %739 = vtanh.f32 %v219_v60  ;;  %v247_v2 = vmul.f32 %v736_v63, %v903_v22  ;;  %v738_v8 = vpop.eup %737  ;;  %v216_v18 = vadd.f32 %v196_v56, %v161_v13 }
  0xa7   :  { %741 = vtanh.f32 %v215_v1  ;;  %v254_v15 = vmul.f32 %v738_v8, %v903_v22 }
  0xa8   :  { %v268_v5 = vsel %vm261_vm1, %v247_v2, 0.0  ;;  %743 = vtanh.f32 %v212_v3 }
  0xa9   :  { %269 = vadd.xlane.f32.xlu1 %v268_v5  ;;  %266 = vadd.xlane.f32.xlu0 %v265_v7  ;;  %v289_v24 = vsel %vm261_vm1, %v254_v15, 0.0 }
  0xaa   :  { %278 = vadd.xlane.f32.xlu2 %v277_v4 }
  0xab   :  { %v171_v9 = vpop.f32.mrf.mxu2  ;;  %v181_v10 = vpop.f32.mrf.mxu3 }
  0xac   :  { %v740_v11 = vpop.eup %739  ;;  %v220_v12 = vadd.f32 %v198_v52, %v171_v9  ;;  %v224_v17 = vadd.f32 %v200_v6, %v181_v10  ;;  %v310_v52 = vlaneseq }
  0xad   :  { %v255_v16 = vmul.f32 %v740_v11, %v903_v22  ;;  %v742_v20 = vpop.eup %741 }
  0xae   :  { %745 = vtanh.f32 %v220_v12  ;;  %v744_v23 = vpop.eup %743  ;;  %v251_v25 = vmul.f32 %v742_v20, %v903_v22  ;;  %v311_v54 = vand.u32 127, %v310_v52 }
  0xaf   :  { %v292_v19 = vsel %vm261_vm1, %v255_v16, 0.0  ;;  %747 = vtanh.f32 %v223_v14  ;;  %v248_v27 = vmul.f32 %v744_v23, %v903_v22 }
  0xb0   :  { %749 = vtanh.f32 %v224_v17  ;;  %v280_v32 = vsel %vm261_vm1, %v251_v25, 0.0  ;;  %v330_v55 = vadd.s32 4294967288, %v311_v54  ;;  %vm312_vm10 = vcmp.lt.s32.totalorder %v311_v54, 8 }
  0xb1   :  { %293 = vadd.xlane.f32.xlu1 %v292_v19  ;;  %290 = vadd.xlane.f32.xlu0 %v289_v24  ;;  %751 = vtanh.f32 %v216_v18  ;;  %v271_v34 = vsel %vm261_vm1, %v248_v27, 0.0 }
  0xb2   :  { %753 = vtanh.f32 %v222_v30 }
  0xb4   :  { %v746_v26 = vpop.eup %745 }
  0xb5   :  { %v256_v28 = vmul.f32 %v746_v26, %v903_v22  ;;  %v748_v29 = vpop.eup %747 }
  0xb6   :  { %v750_v33 = vpop.eup %749  ;;  %v259_v36 = vmul.f32 %v748_v29, %v903_v22 }
  0xb7   :  { %v295_v31 = vsel %vm261_vm1, %v256_v28, 0.0  ;;  %v752_v35 = vpop.eup %751  ;;  %v260_v37 = vmul.f32 %v750_v33, %v903_v22 }
  0xb8   :  { %296 = vadd.xlane.f32.xlu2 %v295_v31  ;;  %v252_v38 = vmul.f32 %v752_v35, %v903_v22  ;;  %v304_v21 = vsel %vm261_vm1, %v259_v36, 0.0  ;;  %v754_v41 = vpop.eup %753 }
  0xb9   :  { %272 = vadd.xlane.f32.xlu1 %v271_v34  ;;  %281 = vadd.xlane.f32.xlu0 %v280_v32  ;;  %v307_v39 = vsel %vm261_vm1, %v260_v37, 0.0  ;;  %v258_v42 = vmul.f32 %v754_v41, %v903_v22 }
  0xba   :  { %v283_v40 = vsel %vm261_vm1, %v252_v38, 0.0  ;;  %v400_v38 = vshrl.u32 %v310_v52, 7 }
  0xbb   :  { %v301_v43 = vsel %vm261_vm1, %v258_v42, 0.0 }
  0xbc   :  { %712 = vset.pattern.permute.xlu2 %v400_v38  ;;  %710 = vset.pattern.permute.xlu0 %v400_v38 }
  0xc0   :  { %305 = vadd.xlane.f32.xlu2 %v304_v21  ;;  %v407_v21 = vadd.s32 8, %v400_v38 }
  0xc1   :  { %284 = vadd.xlane.f32.xlu1 %v283_v40  ;;  %308 = vadd.xlane.f32.xlu0 %v307_v39 }
  0xc2   :  { %711 = vset.pattern.permute.xlu1 %v407_v21 }
  0xc9   :  { %302 = vadd.xlane.f32.xlu1 %v301_v43 }
 0x10c   :  { %v264_v44 = vpop.xlane.xlu0 %263 }
 0x10d   :  { %v276_v45 = vpop.xlane.xlu2 %275  ;;  %v329_v61 = vperm.slane %v264_v44, %v311_v54 }
 0x10e   :  { %v337_v63 = vperm.slane %v276_v45, %v311_v54 }
 0x114   :  { %v300_v46 = vpop.xlane.xlu0 %299 }
 0x115   :  { %v288_v49 = vpop.xlane.xlu2 %287  ;;  %v349_v23 = vperm.slane %v300_v46, %v311_v54 }
 0x116   :  { %v343_v10 = vperm.slane %v288_v49, %v311_v54 }
 0x11c   :  { %v270_v47 = vpop.xlane.xlu1 %269  ;;  %v267_v48 = vpop.xlane.xlu0 %266 }
 0x11d   :  { %v279_v53 = vpop.xlane.xlu2 %278  ;;  %v331_v59 = vperm.slane %v267_v48, %v330_v55  ;;  %v334_v22 = vperm.slane %v270_v47, %v311_v54 }
 0x11e   :  { %v338_v0 = vperm.slane %v279_v53, %v330_v55 }
 0x11f   :  { %v333_v1 = vsel %vm332_vm2, %v331_v59, %v329_v61  ;;  %v42_v59 = vld [vmem:[#allocation2 + $0x10] sm:$0xf] }
 0x120   :  { %v339_v6 = vsel %vm332_vm2, %v338_v0, %v337_v63  ;;  %v386_v63 = vunpack.c.l.bf16 %v42_v59  ;;  %v45_v0 = vld [vmem:[#allocation2 + $0x1c] sm:$0xf] }
 0x124   :  { %v294_v50 = vpop.xlane.xlu1 %293  ;;  %v291_v51 = vpop.xlane.xlu0 %290 }
 0x125   :  { %v344_v7 = vperm.slane %v291_v51, %v330_v55  ;;  %v346_v16 = vperm.slane %v294_v50, %v311_v54 }
 0x127   :  { %v345_v15 = vsel %vm332_vm2, %v344_v7, %v343_v10  ;;  %v389_v10 = vunpack.c.l.bf16 %v45_v0 }
 0x12b   :  { %v297_v60 = vpop.xlane.xlu2 %296 }
 0x12c   :  { %v273_v56 = vpop.xlane.xlu1 %272  ;;  %v282_v58 = vpop.xlane.xlu0 %281  ;;  %v347_v14 = vperm.slane %v297_v60, %v330_v55  ;;  %v43_v60 = vld [vmem:[#allocation2 + $0x14] sm:$0xff]  }
 0x12d   :  { %v335_v57 = vperm.slane %v273_v56, %v330_v55  ;;  %v340_v3 = vperm.slane %v282_v58, %v311_v54 }
 0x12e   :  { %v348_v25 = vsel %vm332_vm2, %v347_v14, %v346_v16  ;;  %v48_v14 = vld [vmem:[#allocation2 + $0x28] sm:$0xff]  }
 0x12f   :  { %v336_v62 = vsel %vm332_vm2, %v335_v57, %v334_v22  ;;  %v39_v57 = vld [vmem:[#allocation2] sm:$0xff]   ;;  %v40_v22 = vld [vmem:[#allocation2 + $0x8] sm:$0xff]  }
 0x130   :  { %v356_v4 = vsel %vm355_vm3, %v336_v62, %v333_v1  ;;  %v383_v61 = vunpack.c.h.bf16 %v39_v57  ;;  %v382_v62 = vunpack.c.l.bf16 %v39_v57  ;;  %v385_v1 = vunpack.c.h.bf16 %v40_v22 }
 0x131   :  { %v358_v9 = vsel %vm357_vm4, %v339_v6, %v356_v4  ;;  %v388_v4 = vunpack.c.h.bf16 %v43_v60  ;;  %v387_v6 = vunpack.c.l.bf16 %v43_v60 }
 0x133   :  { %v306_v12 = vpop.xlane.xlu2 %305 }
 0x134   :  { %v285_v2 = vpop.xlane.xlu1 %284  ;;  %v309_v13 = vpop.xlane.xlu0 %308  ;;  %v352_v17 = vperm.slane %v306_v12, %v311_v54 }
 0x135   :  { %v341_v5 = vperm.slane %v285_v2, %v330_v55  ;;  %v353_v18 = vperm.slane %v309_v13, %v330_v55  ;;  %v46_v2 = vld [vmem:[#allocation2 + $0x20] sm:$0xff]  }
 0x136   :  { %v391_v7 = vunpack.c.h.bf16 %v46_v2  ;;  %v390_v12 = vunpack.c.l.bf16 %v46_v2  ;;  %v53_v2 = vld [vmem:[#allocation2 + $0x38] sm:$0xff]  }
 0x137   :  { %v342_v8 = vsel %vm332_vm2, %v341_v5, %v340_v3  ;;  %v354_v28 = vsel %vm332_vm2, %v353_v18, %v352_v17  ;;  %v384_v5 = vunpack.c.l.bf16 %v40_v22 }
 0x138   :  { %v360_v11 = vsel %vm359_vm5, %v342_v8, %v358_v9 }
 0x139   :  { %v362_v20 = vsel %vm361_vm6, %v345_v15, %v360_v11 }
 0x13a   :  { %v364_v27 = vsel %vm363_vm7, %v348_v25, %v362_v20 }
 0x13c   :  { %v303_v19 = vpop.xlane.xlu1 %302 }
 0x13d   :  { %v350_v24 = vperm.slane %v303_v19, %v330_v55 }
 0x13f   :  { %v351_v26 = vsel %vm332_vm2, %v350_v24, %v349_v23 }
 0x140   :  { %v366_v29 = vsel %vm365_vm8, %v351_v26, %v364_v27  ;;  %v392_v26 = vunpack.c.l.bf16 %v48_v14  ;;  %v50_v27 = vld [vmem:[#allocation2 + $0x30] sm:$0xff]  }
 0x141   :  { %v368_v30 = vsel %vm367_vm9, %v354_v28, %v366_v29 }
 0x142   :  { %v370_v31 = vsel %vm312_vm10, %v368_v30, -1e+30  ;;  %v395_v30 = vunpack.c.h.bf16 %v50_v27 }
 0x143   :  { %v371_v32 = vsel %vm261_vm1, %v370_v31, -inf }
 0x144   :  { %372 = vmax.xlane.f32.xlu1 %v371_v32 }
 0x1b7   :  { %v373_v33 = vpop.xlane.xlu1 %372 }
 0x1b8   :  { %v374_v34 = vsub.f32 %v370_v31, %v373_v33 }
 0x1ba   :  { %v375_v35 = vmul.f32 1.442695, %v374_v34  ;;  %v393_v34 = vunpack.c.h.bf16 %v48_v14 }
 0x1bc   :  { %755 = vpow2.f32 %v375_v35 }
 0x1c2   :  { %v756_v36 = vpop.eup %755 }
 0x1c3   :  { %v377_v37 = vsel %vm261_vm1, %v756_v36, 0.0 }
 0x1c4   :  { %378 = vadd.xlane.f32.xlu2 %v377_v37  ;;  %v394_v37 = vunpack.c.l.bf16 %v50_v27 }
 0x237   :  { %v379_v39 = vpop.xlane.xlu2 %378 }
 0x238   :  { %757 = vrcp.f32 %v379_v39 }
 0x23e   :  { %v758_v40 = vpop.eup %757 }
 0x23f   :  { %v381_v41 = vmul.f32 %v758_v40, %v756_v36 }
 0x241   :  { %590 = vst.msk [vmem:[#allocation5] sm:$0xff] %vm261_vm1, %v381_v41  ;;  %v411_v42 = vperm.slane %v381_v41, 1  ;;  %v398_v43 = vperm.slane %v381_v41, 0  ;;  %v424_v44 = vperm.slane %v381_v41, 2  ;;  %v437_v45 = vperm.slane %v381_v41, 3 }
 0x242   :  { %v476_v46 = vperm.slane %v381_v41, 6  ;;  %v450_v47 = vperm.slane %v381_v41, 4  ;;  %v463_v48 = vperm.slane %v381_v41, 5  ;;  %v489_v49 = vperm.slane %v381_v41, 7  ;;  %618 = dma.vmem_to_hbm [thread:$0]  %s614_s8, 128, %s616_s6, [#allocation4]  }
 0x243   :  { %416 = vperm.xlu2 %712, %v411_v42   ;;  %409 = vperm.xlu1 %711, %v398_v43  }
 0x244   :  { %403 = vperm.xlu0 %710, %v398_v43  }
 0x24b   :  { %713 = vset.pattern.permute.xlu2 %v407_v21  ;;  %714 = vset.pattern.permute.xlu1 %v400_v38 }
 0x24c   :  { %715 = vset.pattern.permute.xlu0 %v407_v21 }
 0x253   :  { %422 = vperm.xlu2 %713, %v411_v42   ;;  %429 = vperm.xlu1 %714, %v424_v44  }
 0x254   :  { %448 = vperm.xlu0 %715, %v437_v45  }
 0x25b   :  { %435 = vperm.xlu2 %713, %v424_v44   ;;  %442 = vperm.xlu1 %714, %v437_v45  }
 0x25c   :  { %718 = vset.pattern.permute.xlu0 %v400_v38 }
 0x263   :  { %716 = vset.pattern.permute.xlu2 %v400_v38  ;;  %717 = vset.pattern.permute.xlu1 %v407_v21 }
 0x264   :  { %481 = vperm.xlu0 %718, %v476_v46  }
 0x26b   :  { %455 = vperm.xlu2 %716, %v450_v47   ;;  %461 = vperm.xlu1 %717, %v450_v47  }
 0x26c   :  { %721 = vset.pattern.permute.xlu0 %v407_v21 }
 0x273   :  { %468 = vperm.xlu2 %716, %v463_v48   ;;  %474 = vperm.xlu1 %717, %v463_v48  }
 0x27b   :  { %719 = vset.pattern.permute.xlu2 %v407_v21  ;;  %720 = vset.pattern.permute.xlu1 %v400_v38 }
 0x283   :  { %487 = vperm.xlu2 %719, %v476_v46   ;;  %494 = vperm.xlu1 %720, %v489_v49  }
 0x28b   :  { %500 = vperm.xlu2 %719, %v489_v49  }
 0x29d   :  { %v417_v50 = vpop.permute.xlu2 %416 }
 0x29e   :  { %v504_v18 = vmul.f32 %v417_v50, %v384_v5 }
 0x2a0   :  { %v527_v21 = vsel %vm110_vm0, %v504_v18, 0.0 }
 0x2ad   :  { %v423_v51 = vpop.permute.xlu2 %422 }
 0x2ae   :  { %v505_v16 = vmul.f32 %v423_v51, %v385_v1 }
 0x2b0   :  { %v528_v31 = vsel %vm110_vm0, %v505_v16, 0.0 }
 0x2b1   :  { %v529_v43 = vadd.f32 %v528_v31, %v527_v21 }
 0x2b5   :  { %v410_v52 = vpop.permute.xlu1 %409  ;;  %v436_v53 = vpop.permute.xlu2 %435 }
 0x2b6   :  { %v404_v56 = vpop.permute.xlu0 %403  ;;  %v503_v8 = vmul.f32 %v410_v52, %v383_v61  ;;  %v507_v19 = vmul.f32 %v436_v53, %v387_v6 }
 0x2b7   :  { %v502_v9 = vmul.f32 %v404_v56, %v382_v62 }
 0x2b8   :  { %v519_v23 = vsel %vm110_vm0, %v503_v8, 0.0  ;;  %v537_v35 = vsel %vm110_vm0, %v507_v19, 0.0  ;;  %v397_v8 = vunpack.c.h.bf16 %v53_v2 }
 0x2b9   :  { %v518_v24 = vsel %vm110_vm0, %v502_v9, 0.0 }
 0x2ba   :  { %v520_v36 = vadd.f32 %v519_v23, %v518_v24 }
 0x2bc   :  { %v521_v50 = vrot.slane %v520_v36, 4 }
 0x2be   :  { %v522_v22 = vadd.f32 %v521_v50, %v520_v36 }
 0x2c5   :  { %v430_v54 = vpop.permute.xlu1 %429  ;;  %v456_v55 = vpop.permute.xlu2 %455 }
 0x2c6   :  { %v449_v11 = vpop.permute.xlu0 %448  ;;  %v506_v13 = vmul.f32 %v430_v54, %v386_v63  ;;  %v510_v28 = vmul.f32 %v456_v55, %v390_v12  ;;  %v530_v55 = vrot.slane %v529_v43, 4 }
 0x2c7   :  { %v509_v25 = vmul.f32 %v449_v11, %v389_v10 }
 0x2c8   :  { %v536_v29 = vsel %vm110_vm0, %v506_v13, 0.0  ;;  %v554_v44 = vsel %vm110_vm0, %v510_v28, 0.0  ;;  %v531_v0 = vadd.f32 %v530_v55, %v529_v43  ;;  %v396_v13 = vunpack.c.l.bf16 %v53_v2 }
 0x2c9   :  { %v538_v39 = vadd.f32 %v537_v35, %v536_v29  ;;  %v546_v40 = vsel %vm110_vm0, %v509_v25, 0.0 }
 0x2ca   :  { %v532_v9 = vrot.slane %v531_v0, 2 }
 0x2cb   :  { %v539_v52 = vrot.slane %v538_v39, 4 }
 0x2cc   :  { %v533_v19 = vadd.f32 %v532_v9, %v531_v0 }
 0x2cd   :  { %v443_v58 = vpop.permute.xlu1 %442  ;;  %v469_v3 = vpop.permute.xlu2 %468  ;;  %v540_v62 = vadd.f32 %v539_v52, %v538_v39 }
 0x2ce   :  { %v508_v17 = vmul.f32 %v443_v58, %v388_v4  ;;  %v512_v41 = vmul.f32 %v469_v3, %v392_v26  ;;  %v523_v4 = vrot.slane %v522_v22, 2 }
 0x2cf   :  { %v541_v6 = vrot.slane %v540_v62, 2 }
 0x2d0   :  { %v545_v32 = vsel %vm110_vm0, %v508_v17, 0.0  ;;  %v563_v53 = vsel %vm110_vm0, %v512_v41, 0.0  ;;  %v524_v14 = vadd.f32 %v523_v4, %v522_v22 }
 0x2d1   :  { %v547_v45 = vadd.f32 %v546_v40, %v545_v32  ;;  %v542_v16 = vadd.f32 %v541_v6, %v540_v62  ;;  %v534_v32 = vrot.slane %v533_v19, 1 }
 0x2d2   :  { %v525_v26 = vrot.slane %v524_v14, 1 }
 0x2d3   :  { %v548_v56 = vrot.slane %v547_v45, 4  ;;  %v543_v28 = vrot.slane %v542_v16, 1  ;;  %v535_v40 = vadd.f32 %v534_v32, %v533_v19 }
 0x2d4   :  { %v526_v36 = vadd.f32 %v525_v26, %v524_v14 }
 0x2d5   :  { %v549_v1 = vadd.f32 %v548_v56, %v547_v45  ;;  %v544_v21 = vadd.f32 %v543_v28, %v542_v16 }
 0x2d6   :  { %v482_v42 = vpop.permute.xlu0 %481 }
 0x2d7   :  { %v514_v51 = vmul.f32 %v482_v42, %v394_v37  ;;  %v550_v10 = vrot.slane %v549_v1, 2 }
 0x2d9   :  { %v572_v60 = vsel %vm110_vm0, %v514_v51, 0.0 }
 0x2dd   :  { %v462_v15 = vpop.permute.xlu1 %461  ;;  %v488_v33 = vpop.permute.xlu2 %487 }
 0x2de   :  { %v511_v20 = vmul.f32 %v462_v15, %v391_v7  ;;  %v515_v46 = vmul.f32 %v488_v33, %v395_v30 }
 0x2e0   :  { %v555_v38 = vsel %vm110_vm0, %v511_v20, 0.0  ;;  %v573_v57 = vsel %vm110_vm0, %v515_v46, 0.0  ;;  %v551_v20 = vadd.f32 %v550_v10, %v549_v1 }
 0x2e1   :  { %v556_v48 = vadd.f32 %v555_v38, %v554_v44  ;;  %v574_v63 = vadd.f32 %v573_v57, %v572_v60  ;;  %v599_v44 = vsel %vm355_vm3, %v535_v40, %v526_v36 }
 0x2e2   :  { %v552_v33 = vrot.slane %v551_v20, 1 }
 0x2e3   :  { %v557_v59 = vrot.slane %v556_v48, 4  ;;  %v575_v7 = vrot.slane %v574_v63, 4 }
 0x2e4   :  { %v553_v41 = vadd.f32 %v552_v33, %v551_v20 }
 0x2e5   :  { %v475_v47 = vpop.permute.xlu1 %474  ;;  %v558_v3 = vadd.f32 %v557_v59, %v556_v48  ;;  %v501_v11 = vpop.permute.xlu2 %500  ;;  %v576_v17 = vadd.f32 %v575_v7, %v574_v63 }
 0x2e6   :  { %v513_v49 = vmul.f32 %v475_v47, %v393_v34  ;;  %v517_v18 = vmul.f32 %v501_v11, %v397_v8  ;;  %v600_v47 = vsel %vm357_vm4, %v544_v21, %v599_v44 }
 0x2e7   :  { %v559_v12 = vrot.slane %v558_v3, 2  ;;  %v577_v29 = vrot.slane %v576_v17, 2 }
 0x2e8   :  { %v564_v54 = vsel %vm110_vm0, %v513_v49, 0.0  ;;  %v582_v30 = vsel %vm110_vm0, %v517_v18, 0.0  ;;  %v601_v49 = vsel %vm359_vm5, %v553_v41, %v600_v47 }
 0x2e9   :  { %v565_v58 = vadd.f32 %v564_v54, %v563_v53  ;;  %v560_v24 = vadd.f32 %v559_v12, %v558_v3  ;;  %v578_v39 = vadd.f32 %v577_v29, %v576_v17 }
 0x2eb   :  { %v566_v61 = vrot.slane %v565_v58, 4  ;;  %v561_v35 = vrot.slane %v560_v24, 1  ;;  %v579_v48 = vrot.slane %v578_v39, 1 }
 0x2ed   :  { %v567_v5 = vadd.f32 %v566_v61, %v565_v58  ;;  %v562_v43 = vadd.f32 %v561_v35, %v560_v24  ;;  %v580_v54 = vadd.f32 %v579_v48, %v578_v39 }
 0x2ef   :  { %v568_v15 = vrot.slane %v567_v5, 2  ;;  %v602_v51 = vsel %vm361_vm6, %v562_v43, %v601_v49 }
 0x2f1   :  { %v569_v27 = vadd.f32 %v568_v15, %v567_v5 }
 0x2f3   :  { %v570_v37 = vrot.slane %v569_v27, 1 }
 0x2f5   :  { %v495_v23 = vpop.permute.xlu1 %494  ;;  %v571_v45 = vadd.f32 %v570_v37, %v569_v27 }
 0x2f6   :  { %v516_v25 = vmul.f32 %v495_v23, %v396_v13 }
 0x2f7   :  { %v603_v53 = vsel %vm363_vm7, %v571_v45, %v602_v51 }
 0x2f8   :  { %v581_v31 = vsel %vm110_vm0, %v516_v25, 0.0  ;;  %v604_v56 = vsel %vm365_vm8, %v580_v54, %v603_v53 }
 0x2f9   :  { %v583_v34 = vadd.f32 %v582_v30, %v581_v31 }
 0x2fb   :  { %v584_v38 = vrot.slane %v583_v34, 4 }
 0x2fd   :  { %v585_v42 = vadd.f32 %v584_v38, %v583_v34 }
 0x2ff   :  { %v586_v46 = vrot.slane %v585_v42, 2 }
 0x301   :  { %v587_v50 = vadd.f32 %v586_v46, %v585_v42 }
 0x303   :  { %v588_v52 = vrot.slane %v587_v50, 1 }
 0x305   :  { %v589_v55 = vadd.f32 %v588_v52, %v587_v50 }
 0x307   :  { %v605_v57 = vsel %vm367_vm9, %v589_v55, %v604_v56 }
 0x308   :  { %607 = vst.msk [vmem:[#allocation6] sm:$0xff] %vm110_vm0, %v605_v57 }
 0x309   :  { %629 = dma.vmem_to_hbm [thread:$0]  %s625_s9, 128, %s627_s12, [#allocation7]  }
 0x30a   :  { %833 = dma.done.wait [#allocation4], 128  }
 0x30b   :  { %834 = vsyncadd [#allocation4], 4294967168 }
 0x30c   :  { %835 = dma.done.wait [#allocation7], 128  }
 0x30d   :  { %836 = vsyncadd [#allocation7], 4294967168 }
 0x30e   :  { %638 = vsyncpa [#allocation3], 1 }
 0x30f   :  { %639 = vsyncpa [#allocation4], 1 }
 0x310   :  { %640 = vsyncpa [#allocation7], 1 }

</bundles_post_ra>
